<compile_context>
chip_gen: v6e
topology: v6e:2x2x1
jax: 0.10.0
libtpu: 0.0.40
codegen_flags: <defaults>
</compile_context>

<pallas_src>
import functools

import jax
import jax.numpy as jnp
from jax.experimental import pallas as pl
from jax.experimental.pallas import tpu as pltpu

D_MODEL = 32
NHEAD = 4
SEQ = 8
BATCH = 2
LN_EPS = 1e-5


def _self_attention_layer_kernel(tgt_ref, pos_ref, w_qkv_t_ref, b_qkv_ref,
                                 w_o_t_ref, b_o_ref, gamma_ref, beta_ref,
                                 out_ref, *, seq, d_model, nhead):
    L, E, H = seq, d_model, nhead
    hd = E // H
    scale = 1.0 / (hd ** 0.5)

    tgt = tgt_ref[...]                                   # (L, E)  value input
    x = tgt + pos_ref[...]                               # (L, E)  q = k = tgt + query_pos

    # Fused QKV projection: single (2L, E) @ (E, 3E) MXU pass.
    stacked = jnp.concatenate([x, tgt], axis=0)                          # (2L, E)
    proj = jnp.dot(stacked, w_qkv_t_ref[...],
                   preferred_element_type=jnp.float32) + b_qkv_ref[...]  # (2L, 3E)

    q = proj[:L, 0 * E:1 * E] * scale                                    # (L, E)
    k = proj[:L, 1 * E:2 * E]                                            # (L, E)
    v = proj[L:, 2 * E:3 * E]                                            # (L, E)

    # Per-head attention; head h lives on static lanes [h*hd, (h+1)*hd).
    o_heads = []
    for h in range(H):
        qh = q[:, h * hd:(h + 1) * hd]                                   # (L, hd)
        kh = k[:, h * hd:(h + 1) * hd]
        vh = v[:, h * hd:(h + 1) * hd]
        s = jnp.einsum('ld,md->lm', qh, kh,
                       preferred_element_type=jnp.float32)               # (L, L)
        s = s - jnp.max(s, axis=-1, keepdims=True)
        p = jnp.exp(s)
        p = p / jnp.sum(p, axis=-1, keepdims=True)                       # exact softmax
        o_heads.append(jnp.dot(p, vh, preferred_element_type=jnp.float32))
    o = jnp.concatenate(o_heads, axis=1)                                 # (L, E)

    # Out-projection: single (L, E) @ (E, E) MXU pass.
    attn_out = jnp.dot(o, w_o_t_ref[...],
                       preferred_element_type=jnp.float32) + b_o_ref[...]

    # Residual + LayerNorm (biased variance, eps=1e-5), matching nn.LayerNorm.
    resid = tgt + attn_out
    mean = jnp.mean(resid, axis=-1, keepdims=True)
    var = jnp.mean((resid - mean) ** 2, axis=-1, keepdims=True)
    normed = (resid - mean) * jax.lax.rsqrt(var + LN_EPS)
    out_ref[...] = normed * gamma_ref[...] + beta_ref[...]               # lane-dense store


def self_attention_layer(tgt, query_pos, params, *, nhead=NHEAD):
    """tgt, query_pos: (L, N, E) seq-first (PyTorch convention). Returns (L, N, E)."""
    L, N, E = tgt.shape
    H = nhead
    w_qkv, b_qkv, w_o, b_o, gamma, beta = params

    # Wrapper-side layout plumbing: batch-major, lane-dense 2-D slabs.
    tgt_slab = jnp.transpose(tgt, (1, 0, 2)).reshape(N * L, E).astype(jnp.float32)
    pos_slab = jnp.transpose(query_pos, (1, 0, 2)).reshape(N * L, E).astype(jnp.float32)

    # Pre-transposed weights (never transposed inside the kernel).
    w_qkv_t = jnp.transpose(w_qkv).astype(jnp.float32)    # (E, 3E)
    w_o_t = jnp.transpose(w_o).astype(jnp.float32)        # (E, E)

    kernel = functools.partial(_self_attention_layer_kernel,
                               seq=L, d_model=E, nhead=H)

    out_slab = pl.pallas_call(
        kernel,
        out_shape=jax.ShapeDtypeStruct((N * L, E), jnp.float32),
        grid_spec=pltpu.PrefetchScalarGridSpec(
            num_scalar_prefetch=0,
            grid=(N,),                                     # one batch item per step
            in_specs=[
                pl.BlockSpec((L, E), lambda n: (n, 0)),          # tgt slab
                pl.BlockSpec((L, E), lambda n: (n, 0)),          # query_pos slab
                pl.BlockSpec((E, 3 * E), lambda n: (0, 0)),      # in_proj weight^T
                pl.BlockSpec((1, 3 * E), lambda n: (0, 0)),      # in_proj bias
                pl.BlockSpec((E, E), lambda n: (0, 0)),          # out_proj weight^T
                pl.BlockSpec((1, E), lambda n: (0, 0)),          # out_proj bias
                pl.BlockSpec((1, E), lambda n: (0, 0)),          # LayerNorm gamma
                pl.BlockSpec((1, E), lambda n: (0, 0)),          # LayerNorm beta
            ],
            out_specs=pl.BlockSpec((L, E), lambda n: (n, 0)),
        ),
        compiler_params=pltpu.CompilerParams(
            dimension_semantics=("parallel",)),
    )(tgt_slab, pos_slab, w_qkv_t, b_qkv, w_o_t, b_o, gamma, beta)

    # Restore seq-first (L, N, E) layout outside the kernel.
    return jnp.transpose(out_slab.reshape(N, L, E), (1, 0, 2))


# ------------------------- parameter construction --------------------------
def make_params(key, d_model):
    """xavier_uniform for dim>1 params; biases zero; LayerNorm gamma=1, beta=0."""
    k1, k2 = jax.random.split(key, 2)

    def xavier(k, shape):
        fan_out, fan_in = shape
        bound = (6.0 / (fan_in + fan_out)) ** 0.5
        return jax.random.uniform(k, shape, jnp.float32, -bound, bound)

    w_qkv = xavier(k1, (3 * d_model, d_model))     # in_proj_weight
    b_qkv = jnp.zeros((1, 3 * d_model), jnp.float32)
    w_o = xavier(k2, (d_model, d_model))           # out_proj.weight
    b_o = jnp.zeros((1, d_model), jnp.float32)
    gamma = jnp.ones((1, d_model), jnp.float32)
    beta = jnp.zeros((1, d_model), jnp.float32)
    return (w_qkv, b_qkv, w_o, b_o, gamma, beta)


# ----------------------------- pure-JAX reference ---------------------------
def reference(tgt, pos, params, nhead):
    w_qkv, b_qkv, w_o, b_o, gamma, beta = params
    L, N, E = tgt.shape
    hd = E // nhead

    def one_batch(t, p):                           # t, p: (L, E)
        qk_in = t + p
        q = qk_in @ w_qkv[:E].T + b_qkv[0, :E]
        k = qk_in @ w_qkv[E:2 * E].T + b_qkv[0, E:2 * E]
        v = t @ w_qkv[2 * E:].T + b_qkv[0, 2 * E:]
        qh = q.reshape(L, nhead, hd).transpose(1, 0, 2) / (hd ** 0.5)
        kh = k.reshape(L, nhead, hd).transpose(1, 0, 2)
        vh = v.reshape(L, nhead, hd).transpose(1, 0, 2)
        s = jnp.einsum('hqd,hkd->hqk', qh, kh)
        a = jax.nn.softmax(s, axis=-1)
        o = jnp.einsum('hqk,hkd->hqd', a, vh).transpose(1, 0, 2).reshape(L, E)
        o = o @ w_o.T + b_o[0]
        r = t + o
        m = r.mean(-1, keepdims=True)
        var = ((r - m) ** 2).mean(-1, keepdims=True)
        return (r - m) / jnp.sqrt(var + LN_EPS) * gamma[0] + beta[0]

    t_nle = jnp.transpose(tgt, (1, 0, 2))
    p_nle = jnp.transpose(pos, (1, 0, 2))
    out = jax.vmap(one_batch)(t_nle, p_nle)
    return jnp.transpose(out, (1, 0, 2))


if __name__ == "__main__":
    key = jax.random.PRNGKey(0)
    k_p, k_t, k_q = jax.random.split(key, 3)

    params = make_params(k_p, D_MODEL)
    tgt = jax.random.normal(k_t, (SEQ, BATCH, D_MODEL), jnp.float32)        # (L, N, E)
    query_pos = jax.random.normal(k_q, (SEQ, BATCH, D_MODEL), jnp.float32)  # (L, N, E)

    out = self_attention_layer(tgt, query_pos, params)
    out = jax.block_until_ready(out)

    ref = reference(tgt, query_pos, params, NHEAD)
    assert out.shape == (SEQ, BATCH, D_MODEL)
    assert jnp.allclose(out, ref, atol=1e-4, rtol=1e-4), \
        float(jnp.max(jnp.abs(out - ref)))

    print("KERNEL_OK")
</pallas_src>

<mosaic_0001>
module attributes {stable_mosaic.version = 11 : i64} {
  func.func @_self_attention_layer_kernel(%arg0: i32, %arg1: memref<8x32xf32, #tpu.memory_space<vmem>>, %arg2: memref<8x32xf32, #tpu.memory_space<vmem>>, %arg3: memref<32x96xf32, #tpu.memory_space<vmem>>, %arg4: memref<1x96xf32, #tpu.memory_space<vmem>>, %arg5: memref<32x32xf32, #tpu.memory_space<vmem>>, %arg6: memref<1x32xf32, #tpu.memory_space<vmem>>, %arg7: memref<1x32xf32, #tpu.memory_space<vmem>>, %arg8: memref<1x32xf32, #tpu.memory_space<vmem>>, %arg9: memref<8x32xf32, #tpu.memory_space<vmem>>) attributes {dimension_semantics = [#tpu.dimension_semantics<parallel>], iteration_bounds = array<i64: 2>, scalar_prefetch = 0 : i64, scratch_operands = 0 : i64, tpu.core_type = #tpu.core_type<tc>, window_params = [{transform_indices = @transform_0, window_bounds = array<i64: 8, 32>}, {transform_indices = @transform_1, window_bounds = array<i64: 8, 32>}, {pipeline_mode = #tpu.pipeline_mode<synchronous>, transform_indices = @transform_2, window_bounds = array<i64: 32, 96>}, {pipeline_mode = #tpu.pipeline_mode<synchronous>, transform_indices = @transform_3, window_bounds = array<i64: 1, 96>}, {pipeline_mode = #tpu.pipeline_mode<synchronous>, transform_indices = @transform_4, window_bounds = array<i64: 32, 32>}, {pipeline_mode = #tpu.pipeline_mode<synchronous>, transform_indices = @transform_5, window_bounds = array<i64: 1, 32>}, {pipeline_mode = #tpu.pipeline_mode<synchronous>, transform_indices = @transform_6, window_bounds = array<i64: 1, 32>}, {pipeline_mode = #tpu.pipeline_mode<synchronous>, transform_indices = @transform_7, window_bounds = array<i64: 1, 32>}, {transform_indices = @transform_8, window_bounds = array<i64: 8, 32>}]} {
    %c0 = arith.constant 0 : index
    %c0_0 = arith.constant 0 : index
    %0 = vector.load %arg1[%c0, %c0_0] : memref<8x32xf32, #tpu.memory_space<vmem>>, vector<8x32xf32>
    %c0_1 = arith.constant 0 : index
    %c0_2 = arith.constant 0 : index
    %1 = vector.load %arg2[%c0_1, %c0_2] : memref<8x32xf32, #tpu.memory_space<vmem>>, vector<8x32xf32>
    %2 = arith.addf %0, %1 : vector<8x32xf32>
    %3 = tpu.concatenate %2, %0 in 0 : vector<8x32xf32>, vector<8x32xf32> -> vector<16x32xf32>
    %c0_3 = arith.constant 0 : index
    %c0_4 = arith.constant 0 : index
    %4 = vector.load %arg3[%c0_3, %c0_4] : memref<32x96xf32, #tpu.memory_space<vmem>>, vector<32x96xf32>
    %cst = arith.constant dense<0.000000e+00> : vector<16x96xf32>
    %5 = tpu.matmul %3, %4, %cst {dimension_numbers = #tpu.dot_dimension_numbers<[1], [0], [0], [1], [0, 0, 1, 1], [], []>} : vector<16x32xf32>, vector<32x96xf32>, vector<16x96xf32> -> vector<16x96xf32>
    %c0_5 = arith.constant 0 : index
    %c0_6 = arith.constant 0 : index
    %6 = vector.load %arg4[%c0_5, %c0_6] : memref<1x96xf32, #tpu.memory_space<vmem>>, vector<1x96xf32>
    %7 = vector.broadcast %6 : vector<1x96xf32> to vector<16x96xf32>
    %8 = arith.addf %5, %7 : vector<16x96xf32>
    %9 = vector.extract_strided_slice %8 {offsets = [0, 0], sizes = [8, 32], strides = [1, 1]} : vector<16x96xf32> to vector<8x32xf32>
    %cst_7 = arith.constant 0.353553385 : f32
    %10 = vector.broadcast %cst_7 : f32 to vector<8x32xf32>
    %11 = arith.mulf %9, %10 : vector<8x32xf32>
    %12 = vector.extract_strided_slice %8 {offsets = [0, 32], sizes = [8, 32], strides = [1, 1]} : vector<16x96xf32> to vector<8x32xf32>
    %13 = vector.extract_strided_slice %8 {offsets = [8, 64], sizes = [8, 32], strides = [1, 1]} : vector<16x96xf32> to vector<8x32xf32>
    %14 = vector.extract_strided_slice %11 {offsets = [0, 0], sizes = [8, 8], strides = [1, 1]} : vector<8x32xf32> to vector<8x8xf32>
    %15 = vector.extract_strided_slice %12 {offsets = [0, 0], sizes = [8, 8], strides = [1, 1]} : vector<8x32xf32> to vector<8x8xf32>
    %16 = vector.extract_strided_slice %13 {offsets = [0, 0], sizes = [8, 8], strides = [1, 1]} : vector<8x32xf32> to vector<8x8xf32>
    "tpu.trace_start"() <{level = 10 : i32, message = "ld,md->lm"}> : () -> ()
    %cst_8 = arith.constant dense<0.000000e+00> : vector<8x8xf32>
    %17 = tpu.matmul %14, %15, %cst_8 {dimension_numbers = #tpu.dot_dimension_numbers<[1], [1], [0], [0], [0, 0, 1, 0], [], []>} : vector<8x8xf32>, vector<8x8xf32>, vector<8x8xf32> -> vector<8x8xf32>
    "tpu.trace_stop"() : () -> ()
    %cst_9 = arith.constant dense<0xFF800000> : vector<8xf32>
    %18 = vector.multi_reduction <maximumf>, %17, %cst_9 [1] : vector<8x8xf32> to vector<8xf32>
    %19 = vector.shape_cast %18 : vector<8xf32> to vector<8x1xf32>
    %20 = vector.broadcast %19 : vector<8x1xf32> to vector<8x8xf32>
    %21 = arith.subf %17, %20 : vector<8x8xf32>
    %22 = math.exp %21 : vector<8x8xf32>
    %cst_10 = arith.constant dense<0.000000e+00> : vector<8xf32>
    %23 = vector.multi_reduction <add>, %22, %cst_10 [1] : vector<8x8xf32> to vector<8xf32>
    %24 = vector.shape_cast %23 : vector<8xf32> to vector<8x1xf32>
    %25 = vector.broadcast %24 : vector<8x1xf32> to vector<8x8xf32>
    %26 = arith.divf %22, %25 : vector<8x8xf32>
    %cst_11 = arith.constant dense<0.000000e+00> : vector<8x8xf32>
    %27 = tpu.matmul %26, %16, %cst_11 {dimension_numbers = #tpu.dot_dimension_numbers<[1], [0], [0], [1], [0, 0, 1, 1], [], []>} : vector<8x8xf32>, vector<8x8xf32>, vector<8x8xf32> -> vector<8x8xf32>
    %28 = vector.extract_strided_slice %11 {offsets = [0, 8], sizes = [8, 8], strides = [1, 1]} : vector<8x32xf32> to vector<8x8xf32>
    %29 = vector.extract_strided_slice %12 {offsets = [0, 8], sizes = [8, 8], strides = [1, 1]} : vector<8x32xf32> to vector<8x8xf32>
    %30 = vector.extract_strided_slice %13 {offsets = [0, 8], sizes = [8, 8], strides = [1, 1]} : vector<8x32xf32> to vector<8x8xf32>
    "tpu.trace_start"() <{level = 10 : i32, message = "ld,md->lm"}> : () -> ()
    %cst_12 = arith.constant dense<0.000000e+00> : vector<8x8xf32>
    %31 = tpu.matmul %28, %29, %cst_12 {dimension_numbers = #tpu.dot_dimension_numbers<[1], [1], [0], [0], [0, 0, 1, 0], [], []>} : vector<8x8xf32>, vector<8x8xf32>, vector<8x8xf32> -> vector<8x8xf32>
    "tpu.trace_stop"() : () -> ()
    %cst_13 = arith.constant dense<0xFF800000> : vector<8xf32>
    %32 = vector.multi_reduction <maximumf>, %31, %cst_13 [1] : vector<8x8xf32> to vector<8xf32>
    %33 = vector.shape_cast %32 : vector<8xf32> to vector<8x1xf32>
    %34 = vector.broadcast %33 : vector<8x1xf32> to vector<8x8xf32>
    %35 = arith.subf %31, %34 : vector<8x8xf32>
    %36 = math.exp %35 : vector<8x8xf32>
    %cst_14 = arith.constant dense<0.000000e+00> : vector<8xf32>
    %37 = vector.multi_reduction <add>, %36, %cst_14 [1] : vector<8x8xf32> to vector<8xf32>
    %38 = vector.shape_cast %37 : vector<8xf32> to vector<8x1xf32>
    %39 = vector.broadcast %38 : vector<8x1xf32> to vector<8x8xf32>
    %40 = arith.divf %36, %39 : vector<8x8xf32>
    %cst_15 = arith.constant dense<0.000000e+00> : vector<8x8xf32>
    %41 = tpu.matmul %40, %30, %cst_15 {dimension_numbers = #tpu.dot_dimension_numbers<[1], [0], [0], [1], [0, 0, 1, 1], [], []>} : vector<8x8xf32>, vector<8x8xf32>, vector<8x8xf32> -> vector<8x8xf32>
    %42 = vector.extract_strided_slice %11 {offsets = [0, 16], sizes = [8, 8], strides = [1, 1]} : vector<8x32xf32> to vector<8x8xf32>
    %43 = vector.extract_strided_slice %12 {offsets = [0, 16], sizes = [8, 8], strides = [1, 1]} : vector<8x32xf32> to vector<8x8xf32>
    %44 = vector.extract_strided_slice %13 {offsets = [0, 16], sizes = [8, 8], strides = [1, 1]} : vector<8x32xf32> to vector<8x8xf32>
    "tpu.trace_start"() <{level = 10 : i32, message = "ld,md->lm"}> : () -> ()
    %cst_16 = arith.constant dense<0.000000e+00> : vector<8x8xf32>
    %45 = tpu.matmul %42, %43, %cst_16 {dimension_numbers = #tpu.dot_dimension_numbers<[1], [1], [0], [0], [0, 0, 1, 0], [], []>} : vector<8x8xf32>, vector<8x8xf32>, vector<8x8xf32> -> vector<8x8xf32>
    "tpu.trace_stop"() : () -> ()
    %cst_17 = arith.constant dense<0xFF800000> : vector<8xf32>
    %46 = vector.multi_reduction <maximumf>, %45, %cst_17 [1] : vector<8x8xf32> to vector<8xf32>
    %47 = vector.shape_cast %46 : vector<8xf32> to vector<8x1xf32>
    %48 = vector.broadcast %47 : vector<8x1xf32> to vector<8x8xf32>
    %49 = arith.subf %45, %48 : vector<8x8xf32>
    %50 = math.exp %49 : vector<8x8xf32>
    %cst_18 = arith.constant dense<0.000000e+00> : vector<8xf32>
    %51 = vector.multi_reduction <add>, %50, %cst_18 [1] : vector<8x8xf32> to vector<8xf32>
    %52 = vector.shape_cast %51 : vector<8xf32> to vector<8x1xf32>
    %53 = vector.broadcast %52 : vector<8x1xf32> to vector<8x8xf32>
    %54 = arith.divf %50, %53 : vector<8x8xf32>
    %cst_19 = arith.constant dense<0.000000e+00> : vector<8x8xf32>
    %55 = tpu.matmul %54, %44, %cst_19 {dimension_numbers = #tpu.dot_dimension_numbers<[1], [0], [0], [1], [0, 0, 1, 1], [], []>} : vector<8x8xf32>, vector<8x8xf32>, vector<8x8xf32> -> vector<8x8xf32>
    %56 = vector.extract_strided_slice %11 {offsets = [0, 24], sizes = [8, 8], strides = [1, 1]} : vector<8x32xf32> to vector<8x8xf32>
    %57 = vector.extract_strided_slice %12 {offsets = [0, 24], sizes = [8, 8], strides = [1, 1]} : vector<8x32xf32> to vector<8x8xf32>
    %58 = vector.extract_strided_slice %13 {offsets = [0, 24], sizes = [8, 8], strides = [1, 1]} : vector<8x32xf32> to vector<8x8xf32>
    "tpu.trace_start"() <{level = 10 : i32, message = "ld,md->lm"}> : () -> ()
    %cst_20 = arith.constant dense<0.000000e+00> : vector<8x8xf32>
    %59 = tpu.matmul %56, %57, %cst_20 {dimension_numbers = #tpu.dot_dimension_numbers<[1], [1], [0], [0], [0, 0, 1, 0], [], []>} : vector<8x8xf32>, vector<8x8xf32>, vector<8x8xf32> -> vector<8x8xf32>
    "tpu.trace_stop"() : () -> ()
    %cst_21 = arith.constant dense<0xFF800000> : vector<8xf32>
    %60 = vector.multi_reduction <maximumf>, %59, %cst_21 [1] : vector<8x8xf32> to vector<8xf32>
    %61 = vector.shape_cast %60 : vector<8xf32> to vector<8x1xf32>
    %62 = vector.broadcast %61 : vector<8x1xf32> to vector<8x8xf32>
    %63 = arith.subf %59, %62 : vector<8x8xf32>
    %64 = math.exp %63 : vector<8x8xf32>
    %cst_22 = arith.constant dense<0.000000e+00> : vector<8xf32>
    %65 = vector.multi_reduction <add>, %64, %cst_22 [1] : vector<8x8xf32> to vector<8xf32>
    %66 = vector.shape_cast %65 : vector<8xf32> to vector<8x1xf32>
    %67 = vector.broadcast %66 : vector<8x1xf32> to vector<8x8xf32>
    %68 = arith.divf %64, %67 : vector<8x8xf32>
    %cst_23 = arith.constant dense<0.000000e+00> : vector<8x8xf32>
    %69 = tpu.matmul %68, %58, %cst_23 {dimension_numbers = #tpu.dot_dimension_numbers<[1], [0], [0], [1], [0, 0, 1, 1], [], []>} : vector<8x8xf32>, vector<8x8xf32>, vector<8x8xf32> -> vector<8x8xf32>
    %70 = tpu.concatenate %27, %41, %55, %69 in 1 : vector<8x8xf32>, vector<8x8xf32>, vector<8x8xf32>, vector<8x8xf32> -> vector<8x32xf32>
    %c0_24 = arith.constant 0 : index
    %c0_25 = arith.constant 0 : index
    %71 = vector.load %arg5[%c0_24, %c0_25] : memref<32x32xf32, #tpu.memory_space<vmem>>, vector<32x32xf32>
    %cst_26 = arith.constant dense<0.000000e+00> : vector<8x32xf32>
    %72 = tpu.matmul %70, %71, %cst_26 {dimension_numbers = #tpu.dot_dimension_numbers<[1], [0], [0], [1], [0, 0, 1, 1], [], []>} : vector<8x32xf32>, vector<32x32xf32>, vector<8x32xf32> -> vector<8x32xf32>
    %c0_27 = arith.constant 0 : index
    %c0_28 = arith.constant 0 : index
    %73 = vector.load %arg6[%c0_27, %c0_28] : memref<1x32xf32, #tpu.memory_space<vmem>>, vector<1x32xf32>
    %74 = vector.broadcast %73 : vector<1x32xf32> to vector<8x32xf32>
    %75 = arith.addf %72, %74 : vector<8x32xf32>
    %76 = arith.addf %0, %75 : vector<8x32xf32>
    %cst_29 = arith.constant dense<0.000000e+00> : vector<8xf32>
    %77 = vector.multi_reduction <add>, %76, %cst_29 [1] : vector<8x32xf32> to vector<8xf32>
    %78 = vector.shape_cast %77 : vector<8xf32> to vector<8x1xf32>
    %cst_30 = arith.constant 3.200000e+01 : f32
    %79 = vector.broadcast %cst_30 : f32 to vector<8x1xf32>
    %80 = arith.divf %78, %79 : vector<8x1xf32>
    %81 = vector.broadcast %80 : vector<8x1xf32> to vector<8x32xf32>
    %82 = arith.subf %76, %81 : vector<8x32xf32>
    %83 = arith.mulf %82, %82 : vector<8x32xf32>
    %cst_31 = arith.constant dense<0.000000e+00> : vector<8xf32>
    %84 = vector.multi_reduction <add>, %83, %cst_31 [1] : vector<8x32xf32> to vector<8xf32>
    %85 = vector.shape_cast %84 : vector<8xf32> to vector<8x1xf32>
    %cst_32 = arith.constant 3.200000e+01 : f32
    %86 = vector.broadcast %cst_32 : f32 to vector<8x1xf32>
    %87 = arith.divf %85, %86 : vector<8x1xf32>
    %88 = vector.broadcast %80 : vector<8x1xf32> to vector<8x32xf32>
    %89 = arith.subf %76, %88 : vector<8x32xf32>
    %cst_33 = arith.constant 9.99999974E-6 : f32
    %90 = vector.broadcast %cst_33 : f32 to vector<8x1xf32>
    %91 = arith.addf %87, %90 : vector<8x1xf32>
    %92 = math.rsqrt %91 : vector<8x1xf32>
    %93 = vector.broadcast %92 : vector<8x1xf32> to vector<8x32xf32>
    %94 = arith.mulf %89, %93 : vector<8x32xf32>
    %c0_34 = arith.constant 0 : index
    %c0_35 = arith.constant 0 : index
    %95 = vector.load %arg7[%c0_34, %c0_35] : memref<1x32xf32, #tpu.memory_space<vmem>>, vector<1x32xf32>
    %96 = vector.broadcast %95 : vector<1x32xf32> to vector<8x32xf32>
    %97 = arith.mulf %94, %96 : vector<8x32xf32>
    %c0_36 = arith.constant 0 : index
    %c0_37 = arith.constant 0 : index
    %98 = vector.load %arg8[%c0_36, %c0_37] : memref<1x32xf32, #tpu.memory_space<vmem>>, vector<1x32xf32>
    %99 = vector.broadcast %98 : vector<1x32xf32> to vector<8x32xf32>
    %100 = arith.addf %97, %99 : vector<8x32xf32>
    %c0_38 = arith.constant 0 : index
    %c0_39 = arith.constant 0 : index
    %101 = vector.load %arg9[%c0_38, %c0_39] : memref<8x32xf32, #tpu.memory_space<vmem>>, vector<8x32xf32>
    tpu.vector_store %arg9[%c0_38, %c0_39], %100 {strides = array<i32>} : memref<8x32xf32, #tpu.memory_space<vmem>>, vector<8x32xf32>,
    return
  }
  func.func @transform_0(%arg0: i32) -> (i32, i32) {
    %c0_i32 = arith.constant 0 : i32
    %c0_i32_0 = arith.constant 0 : i32
    return %arg0, %c0_i32 : i32, i32
  }
  func.func @transform_1(%arg0: i32) -> (i32, i32) {
    %c0_i32 = arith.constant 0 : i32
    %c0_i32_0 = arith.constant 0 : i32
    return %arg0, %c0_i32 : i32, i32
  }
  func.func @transform_2(%arg0: i32) -> (i32, i32) {
    %c0_i32 = arith.constant 0 : i32
    %c0_i32_0 = arith.constant 0 : i32
    %c0_i32_1 = arith.constant 0 : i32
    return %c0_i32, %c0_i32_0 : i32, i32
  }
  func.func @transform_3(%arg0: i32) -> (i32, i32) {
    %c0_i32 = arith.constant 0 : i32
    %c0_i32_0 = arith.constant 0 : i32
    %c0_i32_1 = arith.constant 0 : i32
    return %c0_i32, %c0_i32_0 : i32, i32
  }
  func.func @transform_4(%arg0: i32) -> (i32, i32) {
    %c0_i32 = arith.constant 0 : i32
    %c0_i32_0 = arith.constant 0 : i32
    %c0_i32_1 = arith.constant 0 : i32
    return %c0_i32, %c0_i32_0 : i32, i32
  }
  func.func @transform_5(%arg0: i32) -> (i32, i32) {
    %c0_i32 = arith.constant 0 : i32
    %c0_i32_0 = arith.constant 0 : i32
    %c0_i32_1 = arith.constant 0 : i32
    return %c0_i32, %c0_i32_0 : i32, i32
  }
  func.func @transform_6(%arg0: i32) -> (i32, i32) {
    %c0_i32 = arith.constant 0 : i32
    %c0_i32_0 = arith.constant 0 : i32
    %c0_i32_1 = arith.constant 0 : i32
    return %c0_i32, %c0_i32_0 : i32, i32
  }
  func.func @transform_7(%arg0: i32) -> (i32, i32) {
    %c0_i32 = arith.constant 0 : i32
    %c0_i32_0 = arith.constant 0 : i32
    %c0_i32_1 = arith.constant 0 : i32
    return %c0_i32, %c0_i32_0 : i32, i32
  }
  func.func @transform_8(%arg0: i32) -> (i32, i32) {
    %c0_i32 = arith.constant 0 : i32
    %c0_i32_0 = arith.constant 0 : i32
    return %arg0, %c0_i32 : i32, i32
  }
}

</mosaic_0001>

<bundles_post_ra>
// kernel: tpu_custom_call.1
= control target key start
LH: loop header
LB: loop body
LE: loop exit
PB: predicated region body
PF: predicated region fallthrough
CT: control target
= control target key end

     0   :  { %s2198_s0 = inlined_call_operand.hbm [shape: f32[16,32], index: 0, kind: input, shape index: {}]   ;;  %s2199_s1 = inlined_call_operand.hbm [shape: f32[16,32], index: 1, kind: input, shape index: {}]   ;;  %s2200_s2 = inlined_call_operand.hbm [shape: f32[32,96], index: 2, kind: input, shape index: {}]   ;;  %s2201_s3 = inlined_call_operand.vmem [shape: f32[1,96], index: 3, kind: input, shape index: {}]   ;;  %s2202_s4 = inlined_call_operand.hbm [shape: f32[32,32], index: 4, kind: input, shape index: {}]   ;;  %s2203_s5 = inlined_call_operand.vmem [shape: f32[1,32], index: 5, kind: input, shape index: {}]   ;;  %s2204_s6 = inlined_call_operand.vmem [shape: f32[1,32], index: 6, kind: input, shape index: {}]   ;;  %s2205_s7 = inlined_call_operand.vmem [shape: f32[1,32], index: 7, kind: input, shape index: {}]   ;;  %s2206_s8 = inlined_call_operand.hbm [shape: f32[16,32], index: 8, kind: output, shape index: {}]  }
   0x1   :  { %2214 = sst [smem:[#allocation19_spill]] %s2200_s2 }
   0x2   :  { %2215 = sst [smem:[#allocation20_spill]] %s2202_s4 }
   0x3   :  { %13 = vsyncpa [#allocation3], 0 }
   0x4   :  { %15 = vsyncpa [#allocation3 + $0x1], 0 }
   0x5   :  { %16 = vsyncpa [#allocation6], 0 }
   0x6   :  { %18 = vsyncpa [#allocation6 + $0x1], 0 }
   0x7   :  { %19 = vsyncpa [#allocation9], 0 }
   0x8   :  { %20 = vsyncpa [#allocation4], 0 }
   0x9   :  { %22 = vsyncpa [#allocation4 + $0x1], 0  ;;  %s1894_s27 = smov 0   ;;  %s1896_s28 = smov 0  }
   0xa   :  { %s1898_s29 = smov 0   ;;  %s1900_s30 = smov 0  }
   0xb LB: > { %2216 = sst [smem:[#allocation16_spill]] %s1820_s29  ;;  %s1915_s9 = sadd.s32 4294967295, %s1824_s30   ;;  %s1824_s30 = sphi %s1900_s30, %s2237_s30   ;;  %s1820_s29 = sphi %s1898_s29, %s2239_s29   ;;  %s1816_s28 = sphi %s1896_s28, %s2241_s28   ;;  %s1812_s27 = sphi %s1894_s27, %s2240_s27  }
   0xc   : > { %s1405_s10 = sadd.s32 4294967294, %s1824_s30   ;;  %p48_p0 = scmp.ne.s32.totalorder %s1816_s28, %s1812_s27 }
   0xd   : > { %p2207_p1 = scmp.eq.s32.totalorder %s1915_s9, 0  ;;  %p230_p3 = scmp.eq.s32.totalorder %s1405_s10, 1 }
   0xe   : > { %p1406_p5 = scmp.ge.s32.totalorder %s1824_s30, 1  ;;  %p237_p7 = scmp.lt.s32.totalorder %s1824_s30, 3 }
   0xf   : > { %p1924_p4 = por %p2207_p1, %p48_p0  ;;  %p1929_p6 = por %p230_p3, %p48_p0 }
  0x10   : > { %p1934_p8 = pnand %p1406_p5, %p237_p7  ;;  %s1826_s14 = smov [#allocation7]  }
  0x11   : > { %s2217_s11 = scalar_select %p1924_p4, 1, 0 }
  0x12   : > { %s2218_s12 = scalar_select %p1929_p6, 1, 0 }
  0x13   : > { %s2219_s13 = scalar_select %p1934_p8, 1, 0 }
  0x14   : > { %s249_s15 = sshll.u32 %s1826_s14, 4  ;;  %p1546_p9 = pneg %p1934_p8  ;;  %s250_s15 = int_to_ptr.vmem [resolvable:$true] %s249_s15 }
  0x15   : > { %s1827_s17 = smov [#allocation8]   ;;  %s1651_s19 = scalar_lea.vmem %s250_s15, 512 }
  0x16   : > { %p1943_p11 = pnand %p1546_p9, %p2207_p1  ;;  %s265_s18 = sshll.u32 %s1827_s17, 4  ;;  %s266_s18 = int_to_ptr.vmem [resolvable:$true] %s265_s18 }
  0x17   : > { %p1652_p13 = scmp.ne.s32.totalorder %s250_s15, %s1651_s19  ;;  %p1659_p5 = scmp.lt.s32.totalorder %s250_s15, %s250_s15 }
  0x18   : > { %p1642_p12 = pneg %p1943_p11  ;;  %p1660_p7 = scmp.lt.s32.totalorder %s1651_s19, %s1651_s19 }
  0x1a   : > { %p1654_p0 = pnand %p1652_p13, %p1642_p12  ;;  %p1661_p10 = por %p1660_p7, %p1659_p5 }
  0x1c   : > { %p1655_p3 = pneg %p1654_p0 }
  0x1e   : > { %p1662_p9 = pnand %p1661_p10, %p1655_p3 }
  0x20   : > { %1665 = shalt.err (!%p1662_p9)
}
  0x21   : > { %s1828_s20 = smov 128   ;;  %s1829_s21 = smov 8  }
  0x22   : > { %s2221_s2 = sld [smem:[#allocation19_spill]]  ;;  %s1677_s24 = scalar_lea.vmem %s266_s18, 512 }
  0x23   : > { %p1678_p1 = scmp.ne.s32.totalorder %s266_s18, %s1677_s24  ;;  %p1685_p2 = scmp.lt.s32.totalorder %s266_s18, %s266_s18 }
  0x24   : > { %p1686_p6 = scmp.lt.s32.totalorder %s1677_s24, %s1677_s24 }
  0x25   : > { %p1680_p13 = pnand %p1678_p1, %p1642_p12 }
  0x26   : > { %p1687_p5 = por %p1686_p6, %p1685_p2 }
  0x27   : > { %p1681_p0 = pneg %p1680_p13 }
  0x28   : > { %1549 = dma.hbm_to_vmem [thread:$0]  (!%p1943_p11), %s2221_s2, 512, %s250_s15, [#allocation6], %s1828_s20, %s1828_s20, %s1829_s21  }
  0x29   : > { %p1688_p10 = pnand %p1687_p5, %p1681_p0 }
  0x2b   : > { %1691 = shalt.err (!%p1688_p10)
}
  0x2c   : > { %s2222_s4 = sld [smem:[#allocation20_spill]]  ;;  %s1966_s10 = sadd.s32 1, %s1824_s30  }
  0x2d   : > { %2223 = sst [smem:[#allocation17_spill]] %s1966_s10  ;;  %s35_s14 = sadd.s32 1, %s1820_s29 }
  0x2e   : > { %s32_s15 = ssub.s32 %s1824_s30, %s1966_s10  ;;  %p42_p1 = scmp.ne.s32.totalorder %s1820_s29, %s1816_s28 }
  0x2f   : > { %p33_p2 = scmp.eq.s32.totalorder %s32_s15, 0  ;;  %p43_p6 = scmp.eq.s32.totalorder %s1824_s30, 0 }
  0x30   : > { %p2224_p12 = scmp.eq.s32.totalorder %s1915_s9, 1  ;;  %p1566_p7 = scmp.lt.s32.totalorder %s1824_s30, 2 }
  0x31   : > { %s1982_s17 = scalar_select %p33_p2, %s1820_s29, %s35_s14  }
  0x32   : > { %1552 = dma.hbm_to_vmem [thread:$0]  (!%p1943_p11), %s2222_s4, 512, %s266_s18, [#allocation9], %s1828_s20, %s1828_s20, %s1829_s21  }
  0x33   : > { %p1976_p3 = por %p2224_p12, %p42_p1  ;;  %2226 = sst [smem:[#allocation18_spill]] %s1982_s17 }
  0x34   : > { %p44_p9 = por %p43_p6, %p42_p1  ;;  %s288_s19 = sand.u32 1, %s1820_s29  }
  0x35   : > { %s2225_s16 = scalar_select %p1976_p3, 1, 0 }
  0x36   : > { %s1985_s18 = sshll.u32 %s288_s19, 3  ;;  %s1411_s20 = sshll.u32 %s1824_s30, 7 }
  0x37   : > { %s1991_s23 = scalar_lea.hbm %s2198_s0, %s1411_s20  ;;  %s292_s24 = scalar_lea.vmem [#allocation2], %s1985_s18 }
  0x38   : > { %s299_s25 = sshll.u32 %s292_s24, 4  ;;  %p1996_p11 = pnand %p1566_p7, %p44_p9  ;;  %s1994_s25 = int_to_ptr.vmem [resolvable:$true] %s299_s25 }
  0x39   : > { %s2003_s2 = scalar_lea.hbm %s2199_s1, %s1411_s20  ;;  %s306_s21 = sand.u32 1, %s1824_s30  }
  0x3a   : > { %s289_s22 = scalar_lea.sflag [#allocation3], %s288_s19  ;;  %s1692_s4 = scalar_lea.hbm %s1991_s23, 128 }
  0x3b   : > { %p1693_p13 = scmp.ne.s32.totalorder %s1991_s23, %s1692_s4  ;;  %p1694_p0 = pneg %p1996_p11 }
  0x3c   : > { %s1697_s29 = scalar_lea.hbm %s2198_s0, 256  ;;  %p1698_p1 = scmp.lt.s32.totalorder %s1991_s23, %s2198_s0 }
  0x3d   : > { %p1695_p5 = pnand %p1694_p0, %p1693_p13  ;;  %p1699_p2 = scmp.lt.s32.totalorder %s1697_s29, %s1692_s4 }
  0x3f   : > { %p1696_p10 = pneg %p1695_p5  ;;  %p1700_p6 = por %p1699_p2, %p1698_p1 }
  0x41   : > { %p1701_p12 = pnand %p1700_p6, %p1696_p10 }
  0x43   : > { %1704 = shalt.err (!%p1701_p12)
}
  0x44   : > { %s1705_s19 = scalar_lea.vmem %s1994_s25, 128  ;;  %s1830_s17 = smov [#allocation2]  }
  0x45   : > { %p1706_p7 = scmp.ne.s32.totalorder %s1994_s25, %s1705_s19  ;;  %s1710_s20 = sshll.u32 %s1830_s17, 4  ;;  %s1711_s20 = int_to_ptr.vmem [resolvable:$false] %s1710_s20 }
  0x46   : > { %s1712_s15 = scalar_lea.vmem %s1711_s20, 256  ;;  %p1713_p5 = scmp.lt.s32.totalorder %s1994_s25, %s1711_s20 }
  0x47   : > { %p1708_p9 = pnand %p1706_p7, %p1694_p0  ;;  %p1714_p3 = scmp.lt.s32.totalorder %s1712_s15, %s1705_s19 }
  0x49   : > { %p1709_p13 = pneg %p1708_p9  ;;  %p1715_p4 = por %p1714_p3, %p1713_p5 }
  0x4b   : > { %p1716_p1 = pnand %p1715_p4, %p1709_p13 }
  0x4d   : > { %1719 = shalt.err (!%p1716_p1)
}
  0x4e   : > { %1556 = dma.hbm_to_vmem [thread:$0]  (!%p1996_p11), %s1991_s23, 128, %s1994_s25, %s289_s22  }
  0x4f   : > { %s310_s4 = scalar_lea.vmem [#allocation5], %s1985_s18  ;;  %s307_s10 = scalar_lea.sflag [#allocation6], %s306_s21 }
  0x50   : > { %s317_s29 = sshll.u32 %s310_s4, 4  ;;  %s1720_s24 = scalar_lea.hbm %s2003_s2, 128  ;;  %s318_s29 = int_to_ptr.vmem [resolvable:$true] %s317_s29 }
  0x51   : > { %p1721_p3 = scmp.ne.s32.totalorder %s2003_s2, %s1720_s24  ;;  %s1725_s17 = scalar_lea.hbm %s2199_s1, 256 }
  0x52   : > { %p1726_p2 = scmp.lt.s32.totalorder %s2003_s2, %s2199_s1  ;;  %p1727_p6 = scmp.lt.s32.totalorder %s1725_s17, %s1720_s24 }
  0x53   : > { %p1723_p4 = pnand %p1721_p3, %p1694_p0 }
  0x54   : > { %p1728_p12 = por %p1727_p6, %p1726_p2 }
  0x55   : > { %p1724_p10 = pneg %p1723_p4 }
  0x57   : > { %p1729_p7 = pnand %p1728_p12, %p1724_p10 }
  0x59   : > { %1732 = shalt.err (!%p1729_p7)
}
  0x5a   : > { %s1733_s18 = scalar_lea.vmem %s318_s29, 128  ;;  %s1831_s23 = smov [#allocation5]  }
  0x5b   : > { %p1734_p9 = scmp.ne.s32.totalorder %s318_s29, %s1733_s18  ;;  %s1738_s25 = sshll.u32 %s1831_s23, 4  ;;  %s1739_s25 = int_to_ptr.vmem [resolvable:$false] %s1738_s25 }
  0x5c   : > { %s1740_s21 = scalar_lea.vmem %s1739_s25, 256  ;;  %p1741_p1 = scmp.lt.s32.totalorder %s318_s29, %s1739_s25 }
  0x5d   : > { %p1736_p13 = pnand %p1734_p9, %p1694_p0  ;;  %p1742_p3 = scmp.lt.s32.totalorder %s1740_s21, %s1733_s18 }
  0x5f   : > { %p1737_p5 = pneg %p1736_p13  ;;  %p1743_p4 = por %p1742_p3, %p1741_p1 }
  0x61   : > { %p1744_p8 = pnand %p1743_p4, %p1737_p5 }
  0x63   : > { %1747 = shalt.err (!%p1744_p8)
}
  0x64   : > { %1559 = dma.hbm_to_vmem [thread:$0]  (!%p1996_p11), %s2003_s2, 128, %s318_s29, %s307_s10  }
  0x65   : > { %p2228_p10 = scmp.ne.s32.totalorder %s2219_s13, 0 }
  0x66   : > { %s2054_s22 = sand.u32 (!%p2228_p10), 1, %s1816_s28   ;;  %p2229_p0 = scmp.ne.s32.totalorder (!%p2228_p10), %s2217_s11, 0 }
  0x67   : > { %326 = sbr.rel (%p2228_p10) target bundleno = 2328 (0x918), region = 52  ;;  %s2057_s4 = sshll.u32 (!%p2228_p10), %s2054_s22, 3 }
  0x68   : > { %s329_s24 = scalar_lea.sflag (!%p2228_p10), [#allocation3], %s2054_s22  ;;  %s332_s14 = scalar_lea.vmem (!%p2228_p10), [#allocation2], %s2057_s4 }
  0x6c   : > { %1791 = dma.done.wait (%p2229_p0), %s329_s24, 128  }
  0x6d   : > { %1793 = vsyncadd (%p2229_p0), %s329_s24, 4294967168  ;;  %s337_s2 = sand.u32 1, %s1915_s9   ;;  %s341_s26 = scalar_lea.vmem [#allocation5], %s2057_s4 }
  0x6e   : > { %s338_s13 = scalar_lea.sflag [#allocation6], %s337_s2 }
  0x6f   : > { %1795 = dma.done.wait (%p2229_p0), %s338_s13, 128  }
  0x70   : > { %1797 = vsyncadd (%p2229_p0), %s338_s13, 4294967168  ;;  %p2230_p8 = scmp.eq.s32.totalorder %s1915_s9, 0 }
  0x72   : > { %1799 = dma.done.wait (%p2230_p8), [#allocation6], 512   ;;  %p2231_p11 = pmov %p2230_p8 }
  0x73   : > { %p2232_p2 = pmov %p2230_p8 }
  0x74   : > { %1801 = vsyncadd (%p2231_p11), [#allocation6], 4294966784 }
  0x75   : > { %1803 = dma.done.wait (%p2232_p2), [#allocation9], 512   ;;  %p2233_p6 = pmov %p2232_p2 }
  0x76   : > { %v393_v0 = vld [vmem:[#allocation7 + $0x18] sm:$0xff]  ;;  %v392_v1 = vld [vmem:[#allocation7 + $0x10] sm:$0xff]  ;;  %v2079_v2 = vld [vmem:[%s332_s14] sm:$0xff]  ;;  %vm401_vm0 = vcmask 261120   ;;  %v1832_v7 = vmov 0.0   ;;  %vm1833_vm1 = vmmov 0  }
  0x77   : > { %1805 = vsyncadd (%p2233_p6), [#allocation9], 4294966784  ;;  %1470 = vmatprep.subr.mxu0 %v393_v0  ;;  %v388_v3 = vld [vmem:[%s341_s26] sm:$0xff]  ;;  %v391_v4 = vld [vmem:[#allocation7 + $0x8] sm:$0xff]  ;;  %1481 = vmatprep.subr.mxu1 %v1832_v7  ;;  %s1834_s10 = smov 64   ;;  %s1835_s19 = smov 96  }
  0x78   : > { %1471 = vmatpush3.msra.mxu0 %v393_v0  ;;  %v389_v5 = vadd.f32 %v388_v3, %v2079_v2  ;;  %v390_v6 = vld [vmem:[#allocation7] sm:$0xff]  ;;  %1483 = vmatprep.mubr.msk.f32.mxu1 %vm1833_vm1, %v1832_v7  ;;  %s1836_s17 = smov 88   ;;  %s1837_s20 = smov 120   ;;  %vm487_vm2 = vcmask 64512   ;;  %vm1159_vm3 = vcmask 130048   ;;  %vm1161_vm4 = vcmask 195584  }
  0x79   : > { %1472 = vmatprep.subr.mxu0 %v392_v1  ;;  %v1420_v8 = vld [vmem:[%s2201_s3] ss:$0 sm:$0xff]  ;;  %s1838_s15 = smov 80   ;;  %s1839_s18 = smov 72  }
  0x7a   : > { %1473 = vmatpush3.msra.mxu0 %v392_v1  ;;  %1478 = vmatprep.mubr.msk.f32.mxu0 %vm401_vm0, %v389_v5  ;;  %s1840_s23 = smov 112   ;;  %s1841_s25 = smov 104  }
  0x7b   : > { %1474 = vmatprep.subr.mxu0 %v391_v4  ;;  %s1842_s21 = smov 56   ;;  %s1843_s24 = smov 48  }
  0x7c   : > { %1475 = vmatpush3.msra.mxu0 %v391_v4  ;;  %s1844_s14 = smov 40   ;;  %s1845_s2 = smov 8  }
  0x7d   : > { %1476 = vmatprep.subr.mxu0 %v390_v6  ;;  %s1846_s13 = smov 16   ;;  %s1847_s26 = smov 24  }
  0x7e   : > { %1477 = vmatpush3.msra.mxu0 %v390_v6  ;;  %p2234_p7 = scmp.ne.s32.totalorder %s2225_s16, 0 }
  0x7f   : > { %1479 = vmatmul.mubr.msk.f32.vlgmr.msra.gmra.mxu0 %vm401_vm0, %v2079_v2  ;;  %1501 = vmatprep.subr.mxu0 %v1832_v7 }
  0x80   : > { %1503 = vmatprep.mubr.msk.f32.mxu0 %vm1833_vm1, %v1832_v7 }
 0x13f   : > { %v1480_v9 = vpop.f32.mrf.mxu0 }
 0x140   : > { %v2094_v10 = vadd.f32 %v1480_v9, %v1420_v8  ;;  %v1166_v9 = vld [vmem:[#allocation8 + $0x18] sm:$0xff] }
 0x141   : > { %v474_v11 = vpop.f32.mrf.mxu0 }
 0x142   : > { %v475_v12 = vadd.f32 %v1420_v8, %v474_v11  ;;  %575 = vrot.lane.b32.xlu1 %v2094_v10, %s1834_s10  ;;  %v1164_v11 = vld [vmem:[#allocation8 + $0x8] sm:$0xff] }
 0x144   : > { %485 = vrot.lane.b32.xlu0 %v475_v12, %s1835_s19  ;;  %v483_v13 = vmul.f32 0.35355338, %v475_v12 }
 0x146   : > { %653 = vrot.lane.b32.xlu1 %v475_v12, %s1836_s17 }
 0x14a   : > { %651 = vrot.lane.b32.xlu1 %v483_v13, %s1837_s20 }
 0x14e   : > { %818 = vrot.lane.b32.xlu1 %v475_v12, %s1838_s15  ;;  %s1440_s15 = sshll.u32 %s1915_s9, 7 }
 0x1b4   : > { %v576_v14 = vpop.permute.xlu1 %575 }
 0x1b6   : > { %v486_v15 = vpop.permute.xlu0 %485 }
 0x1b7   : > { %1482 = vmatpush3.xpose.msk.msra.mxu1 %vm487_vm2, %v486_v15 }
 0x1b8   : > { %v654_v16 = vpop.permute.xlu1 %653  ;;  %1486 = vmatprep.subr.mxu1 %v1832_v7 }
 0x1ba   : > { %1484 = vmatmul.mubr.msk.f32.vlgmr.msra.gmra.mxu1 %vm487_vm2, %v483_v13 }
 0x1bb   : > { %1487 = vmatpush3.msra.mxu1 %v576_v14  ;;  %1488 = vmatprep.mubr.msk.f32.mxu1 %vm1833_vm1, %v1832_v7 }
 0x1bc   : > { %v652_v17 = vpop.permute.xlu1 %651  ;;  %1491 = vmatprep.subr.mxu1 %v1832_v7 }
 0x1c0   : > { %v819_v18 = vpop.permute.xlu1 %818 }
 0x1c1   : > { %1502 = vmatpush3.xpose.msk.msra.mxu0 %vm487_vm2, %v819_v18 }
 0x1c2   : > { %1511 = vmatprep.subr.mxu0 %v1832_v7 }
 0x27a   : > { %v559_v19 = vpop.f32.mrf.mxu1 }
 0x27b   : > { %v563_v20 = vsel %vm487_vm2, %v559_v19, -inf }
 0x27c   : > { %564 = vmax.xlane.f32.xlu0 %v563_v20  ;;  %v1485_v21 = vpop.f32.mrf.mxu1 }
 0x292   : > { %983 = vrot.lane.b32.xlu0 %v475_v12, %s1839_s18  ;;  %v1163_v12 = vld [vmem:[#allocation8] sm:$0xff]  ;;  %s386_s18 = scalar_lea.vmem [#allocation10], %s2057_s4 }
 0x305   : > { %v565_v22 = vpop.xlane.xlu0 %564 }
 0x306   : > { %v566_v23 = vsub.f32 %v559_v19, %v565_v22 }
 0x308   : > { %v567_v24 = vmul.f32 1.442695, %v566_v23 }
 0x309   : > { %v984_v29 = vpop.permute.xlu0 %983 }
 0x30a   : > { %1622 = vpow2.f32 %v567_v24  ;;  %v1435_v24 = vld [vmem:[%s2203_s5] ss:$0 sm:$0xff] }
 0x317   : > { %v1623_v25 = vpop.eup %1622 }
 0x318   : > { %v569_v26 = vsel %vm487_vm2, %v1623_v25, 0.0 }
 0x319   : > { %570 = vadd.xlane.f32.xlu1 %v569_v26 }
 0x32a   : > { %816 = vrot.lane.b32.xlu1 %v483_v13, %s1840_s23  ;;  %s1293_s23 = sshll.u32 %s386_s18, 4  ;;  %s1294_s23 = int_to_ptr.vmem [resolvable:$true] %s1293_s23 }
 0x32e   : > { %981 = vrot.lane.b32.xlu1 %v483_v13, %s1841_s25 }
 0x3a2   : > { %v571_v27 = vpop.xlane.xlu1 %570 }
 0x3a3   : > { %1624 = vrcp.f32 %v571_v27 }
 0x3a6   : > { %v817_v28 = vpop.permute.xlu1 %816 }
 0x3a7   : > { %1504 = vmatmul.mubr.msk.f32.vlgmr.msra.gmra.mxu0 %vm487_vm2, %v817_v28 }
 0x3a8   : > { %1512 = vmatpush3.xpose.msk.msra.mxu0 %vm487_vm2, %v984_v29  ;;  %1513 = vmatprep.mubr.msk.f32.mxu0 %vm1833_vm1, %v1832_v7 }
 0x3a9   : > { %1521 = vmatprep.subr.mxu0 %v1832_v7 }
 0x3aa   : > { %v982_v30 = vpop.permute.xlu1 %981 }
 0x3ab   : > { %1514 = vmatmul.mubr.msk.f32.vlgmr.msra.gmra.mxu0 %vm487_vm2, %v982_v30 }
 0x3ac   : > { %1529 = vmatprep.mubr.msk.f32.mxu0 %vm1833_vm1, %v1832_v7  ;;  %1522 = vmatpush3.msra.mxu0 %v1166_v9 }
 0x3ad   : > { %1523 = vmatprep.subr.mxu0 %v1832_v7 }
 0x3b0   : > { %v1625_v31 = vpop.eup %1624 }
 0x3b1   : > { %v573_v32 = vmul.f32 %v1625_v31, %v1623_v25 }
 0x3b3   : > { %1489 = vmatmul.mubr.msk.f32.vlgmr.msra.gmra.mxu1 %vm487_vm2, %v573_v32 }
 0x3b4   : > { %1492 = vmatpush3.xpose.msk.msra.mxu1 %vm487_vm2, %v654_v16  ;;  %1493 = vmatprep.mubr.msk.f32.mxu1 %vm1833_vm1, %v1832_v7 }
 0x3b5   : > { %1496 = vmatprep.subr.mxu1 %v1832_v7 }
 0x3b7   : > { %1494 = vmatmul.mubr.msk.f32.vlgmr.msra.gmra.mxu1 %vm487_vm2, %v652_v17 }
 0x3b8   : > { %1498 = vmatprep.mubr.msk.f32.mxu1 %vm1833_vm1, %v1832_v7 }
 0x467   : > { %v890_v33 = vpop.f32.mrf.mxu0 }
 0x468   : > { %v894_v34 = vsel %vm487_vm2, %v890_v33, -inf }
 0x469   : > { %895 = vmax.xlane.f32.xlu0 %v894_v34  ;;  %v1505_v35 = vpop.f32.mrf.mxu0 }
 0x46b   : > { %v1055_v36 = vpop.f32.mrf.mxu0 }
 0x46c   : > { %v1059_v43 = vsel %vm487_vm2, %v1055_v36, -inf }
 0x46d   : > { %v1515_v37 = vpop.f32.mrf.mxu0 }
 0x473   : > { %v2124_v38 = vpop.f32.mrf.mxu1 }
 0x475   : > { %v1490_v39 = vpop.f32.mrf.mxu1 }
 0x477   : > { %v725_v40 = vpop.f32.mrf.mxu1 }
 0x478   : > { %v729_v41 = vsel %vm487_vm2, %v725_v40, -inf }
 0x479   : > { %730 = vmax.xlane.f32.xlu1 %v729_v41  ;;  %v1495_v42 = vpop.f32.mrf.mxu1 }
 0x47d   : > { %1060 = vmax.xlane.f32.xlu1 %v1059_v43 }
 0x4f2   : > { %v896_v44 = vpop.xlane.xlu0 %895 }
 0x4f3   : > { %v897_v45 = vsub.f32 %v890_v33, %v896_v44 }
 0x4f5   : > { %v898_v46 = vmul.f32 1.442695, %v897_v45 }
 0x4f7   : > { %1626 = vpow2.f32 %v898_v46 }
 0x502   : > { %v731_v47 = vpop.xlane.xlu1 %730 }
 0x503   : > { %v732_v55 = vsub.f32 %v725_v40, %v731_v47  ;;  %v1438_v40 = vld [vmem:[%s2205_s7] ss:$0 sm:$0xff] }
 0x504   : > { %v1627_v48 = vpop.eup %1626 }
 0x505   : > { %v900_v49 = vsel %vm487_vm2, %v1627_v48, 0.0  ;;  %v733_v56 = vmul.f32 1.442695, %v732_v55 }
 0x506   : > { %901 = vadd.xlane.f32.xlu1 %v900_v49  ;;  %v1061_v50 = vpop.xlane.xlu1 %1060 }
 0x507   : > { %v1062_v51 = vsub.f32 %v1055_v36, %v1061_v50 }
 0x509   : > { %v1063_v52 = vmul.f32 1.442695, %v1062_v51 }
 0x50b   : > { %1628 = vpow2.f32 %v1063_v52 }
 0x50c   : > { %1630 = vpow2.f32 %v733_v56 }
 0x517   : > { %740 = vrot.lane.b32.xlu1 %v2094_v10, %s1842_s21 }
 0x518   : > { %v1629_v53 = vpop.eup %1628 }
 0x519   : > { %v1065_v54 = vsel %vm487_vm2, %v1629_v53, 0.0  ;;  %v1631_v57 = vpop.eup %1630 }
 0x51a   : > { %1066 = vadd.xlane.f32.xlu0 %v1065_v54  ;;  %v735_v58 = vsel %vm487_vm2, %v1631_v57, 0.0 }
 0x530   : > { %905 = vrot.lane.b32.xlu0 %v2094_v10, %s1843_s24  ;;  %s1291_s24 = scalar_lea.hbm %s2206_s8, %s1440_s15 }
 0x53b   : > { %736 = vadd.xlane.f32.xlu1 %v735_v58 }
 0x54c   : > { %1070 = vrot.lane.b32.xlu1 %v2094_v10, %s1844_s14  ;;  %v1165_v10 = vld [vmem:[#allocation8 + $0x10] sm:$0xff]  ;;  %s1280_s14 = scalar_lea.sflag [#allocation4], %s2054_s22 }
 0x54d   : > { %1524 = vmatpush3.msra.mxu0 %v1165_v10 }
 0x54e   : > { %1525 = vmatprep.subr.mxu0 %v1832_v7 }
 0x54f   : > { %1526 = vmatpush3.msra.mxu0 %v1164_v11 }
 0x550   : > { %1527 = vmatprep.subr.mxu0 %v1832_v7 }
 0x551   : > { %1528 = vmatpush3.msra.mxu0 %v1163_v12 }
 0x58f   : > { %v902_v59 = vpop.xlane.xlu1 %901 }
 0x593   : > { %v741_v60 = vpop.permute.xlu1 %740 }
 0x594   : > { %1497 = vmatpush3.msra.mxu1 %v741_v60 }
 0x595   : > { %1506 = vmatprep.subr.mxu1 %v1832_v7 }
 0x5a3   : > { %v1067_v62 = vpop.xlane.xlu0 %1066 }
 0x5a7   : > { %v906_v3 = vpop.permute.xlu0 %905 }
 0x5c4   : > { %v737_v61 = vpop.xlane.xlu1 %736 }
 0x5c5   : > { %1632 = vrcp.f32 %v737_v61 }
 0x5c6   : > { %1634 = vrcp.f32 %v902_v59 }
 0x5c7   : > { %1636 = vrcp.f32 %v1067_v62 }
 0x5c8   : > { %v1071_v6 = vpop.permute.xlu1 %1070 }
 0x5d2   : > { %v1633_v63 = vpop.eup %1632 }
 0x5d3   : > { %v739_v0 = vmul.f32 %v1633_v63, %v1631_v57  ;;  %v1635_v1 = vpop.eup %1634 }
 0x5d4   : > { %v904_v4 = vmul.f32 %v1635_v1, %v1627_v48  ;;  %v1637_v5 = vpop.eup %1636 }
 0x5d5   : > { %1499 = vmatmul.mubr.msk.f32.vlgmr.msra.gmra.mxu1 %vm487_vm2, %v739_v0  ;;  %v1069_v8 = vmul.f32 %v1637_v5, %v1629_v53 }
 0x5d6   : > { %1507 = vmatpush3.msra.mxu1 %v906_v3  ;;  %1508 = vmatprep.mubr.msk.f32.mxu1 %vm1833_vm1, %v1832_v7 }
 0x5d7   : > { %1516 = vmatprep.subr.mxu1 %v1832_v7 }
 0x5d9   : > { %1509 = vmatmul.mubr.msk.f32.vlgmr.msra.gmra.mxu1 %vm487_vm2, %v904_v4 }
 0x5da   : > { %1517 = vmatpush3.msra.mxu1 %v1071_v6  ;;  %1518 = vmatprep.mubr.msk.f32.mxu1 %vm1833_vm1, %v1832_v7 }
 0x5dd   : > { %1519 = vmatmul.mubr.msk.f32.vlgmr.msra.gmra.mxu1 %vm487_vm2, %v1069_v8 }
 0x695   : > { %v812_v13 = vpop.f32.mrf.mxu1 }
 0x696   : > { %1147 = vrot.lane.b32.xlu1 %v812_v13, %s1845_s2  ;;  %s1748_s2 = scalar_lea.vmem %s1294_s23, 128 }
 0x697   : > { %v1500_v14 = vpop.f32.mrf.mxu1  ;;  %p1749_p12 = scmp.ne.s32.totalorder %s1294_s23, %s1748_s2 }
 0x699   : > { %v977_v15 = vpop.f32.mrf.mxu1  ;;  %p1750_p9 = pnand %p1749_p12, %p2234_p7 }
 0x69a   : > { %1151 = vrot.lane.b32.xlu0 %v977_v15, %s1846_s13  ;;  %s1848_s13 = smov [#allocation10]  }
 0x69b   : > { %v1510_v16 = vpop.f32.mrf.mxu1  ;;  %p1751_p13 = pneg %p1750_p9 }
 0x69d   : > { %v1142_v17 = vpop.f32.mrf.mxu1 }
 0x69e   : > { %1155 = vrot.lane.b32.xlu1 %v1142_v17, %s1847_s26  ;;  %s1752_s26 = sshll.u32 %s1848_s13, 4  ;;  %s1753_s26 = int_to_ptr.vmem [resolvable:$false] %s1752_s26 }
 0x69f   : > { %v1520_v18 = vpop.f32.mrf.mxu1  ;;  %s1754_s9 = scalar_lea.vmem %s1753_s26, 256  ;;  %p1755_p5 = scmp.lt.s32.totalorder %s1294_s23, %s1753_s26 }
 0x6a0   : > { %p1756_p1 = scmp.lt.s32.totalorder %s1754_s9, %s1748_s2 }
 0x6a2   : > { %p1757_p3 = por %p1756_p1, %p1755_p5 }
 0x6a4   : > { %p1758_p4 = pnand %p1757_p3, %p1751_p13 }
 0x708   : > { %v1148_v19 = vpop.permute.xlu1 %1147 }
 0x709   : > { %v1158_v7 = vsel %vm487_vm2, %v2124_v38, %v1148_v19 }
 0x70c   : > { %v1152_v20 = vpop.permute.xlu0 %1151 }
 0x70d   : > { %v1160_v21 = vsel %vm1159_vm3, %v1158_v7, %v1152_v20 }
 0x710   : > { %v1156_v22 = vpop.permute.xlu1 %1155 }
 0x711   : > { %v1162_v23 = vsel %vm1161_vm4, %v1160_v21, %v1156_v22 }
 0x712   : > { %1530 = vmatmul.mubr.msk.f32.vlgmr.msra.gmra.mxu0 %vm401_vm0, %v1162_v23 }
 0x7d2   : > { %v1243_v25 = vpop.f32.mrf.mxu0 }
 0x7d3   : > { %v1244_v26 = vadd.f32 %v1435_v24, %v1243_v25 }
 0x7d4   : > { %v1531_v27 = vpop.f32.mrf.mxu0 }
 0x7d5   : > { %v1247_v28 = vadd.f32 %v1244_v26, %v2079_v2  ;;  %v1437_v2 = vld [vmem:[%s2204_s6] ss:$0 sm:$0xff] }
 0x7d7   : > { %v1248_v29 = vsel %vm401_vm0, %v1247_v28, 0.0 }
 0x7d8   : > { %1249 = vadd.xlane.f32.xlu0 %v1248_v29 }
 0x861   : > { %v1250_v30 = vpop.xlane.xlu0 %1249 }
 0x862   : > { %v1252_v31 = vmul.f32 0.03125, %v1250_v30 }
 0x864   : > { %v1253_v32 = vsub.f32 %v1247_v28, %v1252_v31 }
 0x866   : > { %v1254_v33 = vmul.f32 %v1253_v32, %v1253_v32 }
 0x868   : > { %v1255_v34 = vsel %vm401_vm0, %v1254_v33, 0.0 }
 0x869   : > { %1256 = vadd.xlane.f32.xlu1 %v1255_v34 }
 0x8f2   : > { %v1257_v35 = vpop.xlane.xlu1 %1256 }
 0x8f3   : > { %v1258_v36 = vmul.f32 0.03125, %v1257_v35 }
 0x8f5   : > { %v1259_v37 = vadd.f32 1e-05, %v1258_v36 }
 0x8f7   : > { %1638 = vrsqrt.f32 %v1259_v37 }
 0x904   : > { %v1639_v38 = vpop.eup %1638 }
 0x905   : > { %v1261_v39 = vmul.f32 %v1639_v38, %v1253_v32 }
 0x907   : > { %v1269_v41 = vmul.f32 %v1437_v2, %v1261_v39 }
 0x909   : > { %v1277_v42 = vadd.f32 %v1438_v40, %v1269_v41 }
 0x90b   : > { %1278 = vst.msk [vmem:[%s386_s18] sm:$0xff] %vm401_vm0, %v1277_v42 }
 0x90c   : > { %1761 = shalt.err (!%p1758_p4)
}
 0x90d   : > { %s1762_s4 = scalar_lea.hbm %s1291_s24, 128  ;;  %s1766_s29 = scalar_lea.hbm %s2206_s8, 256 }
 0x90e   : > { %p1763_p10 = scmp.ne.s32.totalorder %s1291_s24, %s1762_s4  ;;  %p1767_p11 = scmp.lt.s32.totalorder %s1291_s24, %s2206_s8 }
 0x90f   : > { %p1768_p2 = scmp.lt.s32.totalorder %s1766_s29, %s1762_s4 }
 0x910   : > { %p1764_p0 = pnand %p1763_p10, %p2234_p7 }
 0x911   : > { %p1769_p6 = por %p1768_p2, %p1767_p11 }
 0x912   : > { %p1765_p8 = pneg %p1764_p0 }
 0x914   : > { %p1770_p12 = pnand %p1769_p6, %p1765_p8 }
 0x916   : > { %1773 = shalt.err (!%p1770_p12)
}
 0x917   : > { %1544 = dma.vmem_to_hbm [thread:$0]  (%p2234_p7), %s1294_s23, 128, %s1291_s24, %s1280_s14  }
 0x918 PF: > { %s1305_s17 = sand.u32 1, %s1812_s27   ;;  %p2235_p9 = scmp.ne.s32.totalorder %s2218_s12, 0 }
 0x919   : > { %p2236_p13 = scmp.ge.s32.totalorder %s1824_s30, 2  ;;  %s1306_s20 = scalar_lea.sflag [#allocation4], %s1305_s17 }
 0x91b   : > { %p1561_p5 = pnand %p2236_p13, %p2235_p9 }
 0x91d   : > { %p1562_p1 = pneg %p1561_p5 }
 0x91f   : > { %1807 = dma.done.wait (%p1562_p1), %s1306_s20, 128  }
 0x920   : > { %1809 = vsyncadd (%p1562_p1), %s1306_s20, 4294967168  ;;  %s2237_s30 = sld [smem:[#allocation17_spill]]  ;;  %s2240_s27 = smov %s1816_s28 }
 0x921   : > { %s2238_s15 = sld [smem:[#allocation16_spill]] }
 0x922   : > { %s2239_s29 = sld [smem:[#allocation18_spill]] }
 0x926   : > { %p25_p3 = scmp.ge.s32.totalorder %s2237_s30, 4  }
 0x927   : > { %s2241_s28 = smov %s2238_s15 }
 0x928   :  { %27 = sbr.rel (!%p25_p3) target bundleno = 11 (0xb), region = 118 }
 0x92d   :  { %1311 = vsyncpa [#allocation3], 1 }
 0x92e   :  { %1313 = vsyncpa [#allocation3 + $0x1], 1 }
 0x92f   :  { %1314 = vsyncpa [#allocation6], 1 }
 0x930   :  { %1316 = vsyncpa [#allocation6 + $0x1], 1 }
 0x931   :  { %1317 = vsyncpa [#allocation9], 1 }
 0x932   :  { %1318 = vsyncpa [#allocation4], 1 }
 0x933   :  { %1320 = vsyncpa [#allocation4 + $0x1], 1 }

</bundles_post_ra>
